<compile_context>
chip_gen: v7x
topology: tpu7x:2x2x1
jax: 0.10.0
libtpu: 0.0.40
codegen_flags: <defaults>
</compile_context>

<pallas_src>
import functools

import jax
import jax.numpy as jnp
from jax import lax
from jax.experimental import pallas as pl
from jax.experimental.pallas import tpu as pltpu

LEAKY_SLOPE = 0.01   # nn.LeakyReLU() default
BN_EPS = 1e-5        # nn.BatchNorm2d default


# ---------------------------------------------------------------------------
# Kernel
# ---------------------------------------------------------------------------
def _conv_bn_lrelu_kernel(prev_ref, cur_ref, next_ref, w_ref, b_ref, o_ref,
                          xbuf, sbuf, *, W, KH, KW, PAD, T, A, BH, C_IN):
    """One spatial tile of fused 'same' conv + folded-BN bias + LeakyReLU.

    prev_ref: (1, C_in, BH)   lane-aligned halo block just *before* this tile (f32)
    cur_ref:  (1, C_in, T)    the tile's own flat pixels (f32)
    next_ref: (1, C_in, BH)   lane-aligned halo block just *after* this tile (f32)
    w_ref:    (C_out, KH*KW*C_in)  BN-scale-folded conv weight (bf16)
    b_ref:    (C_out, 1)      folded BN bias (f32)
    o_ref:    (1, C_out, T)   output tile, lane-dense last dim
    xbuf:     (C_in, T + 2A)  VMEM scratch: [top halo | tile | bottom halo] (bf16)
    sbuf:     (KH*KW*C_in, T) VMEM scratch: staged shifted views (bf16)
    """
    t = pl.program_id(1)
    n_tiles = pl.num_programs(1)
    cdt = xbuf.dtype

    # ---- assemble [top halo | tile | bottom halo]; f32->bf16 cast fused here.
    xbuf[:, A:A + T] = cur_ref[0].astype(cdt)

    @pl.when(t > 0)
    def _():
        xbuf[:, :A] = prev_ref[0, :, BH - A:].astype(cdt)

    @pl.when(t == 0)                       # top image border -> zero apron
    def _():
        xbuf[:, :A] = jnp.zeros((C_IN, A), cdt)

    @pl.when(t < n_tiles - 1)
    def _():
        xbuf[:, A + T:] = next_ref[0, :, :A].astype(cdt)

    @pl.when(t == n_tiles - 1)             # bottom image border -> zero apron
    def _():
        xbuf[:, A + T:] = jnp.zeros((C_IN, A), cdt)

    # ---- column-validity masks generated in-kernel (no mask operand / DMA).
    # The tile starts on a row boundary, so column index = flat_pos % W.
    col = lax.broadcasted_iota(jnp.int32, (1, T), 1) % W
    valid = {}
    for j in range(KW):
        d = j - PAD
        if d != 0:
            valid[j] = (col + d >= 0) & (col + d < W)

    # ---- stage the KH*KW shifted views into one (KH*KW*C_in, T) MXU operand.
    # TODO(synk): pltpu.roll-based lane-aligned staging to avoid per-tap relayout.
    for i in range(KH):
        for j in range(KW):
            s = i * W + j                          # flat shift of tap (i, j)
            xs = xbuf[:, s:s + T]                  # (C_in, T) static slice
            if j in valid:                         # kill column-wrap reads
                xs = jnp.where(valid[j], xs, jnp.zeros((), cdt))
            r0 = (i * KW + j) * C_IN
            sbuf[r0:r0 + C_IN, :] = xs

    # ---- one fused MXU matmul (K = KH*KW*C_in), f32 accumulation + epilogue.
    y = jnp.dot(w_ref[...], sbuf[...], preferred_element_type=jnp.float32)
    y = y + b_ref[...]                             # folded BN bias, lane-broadcast
    o_ref[0] = jnp.maximum(y, LEAKY_SLOPE * y).astype(o_ref.dtype)


# ---------------------------------------------------------------------------
# Tile-size selection (trace-time Python)
# ---------------------------------------------------------------------------
def _pick_halo_block(T, halo):
    """Smallest lane-aligned (multiple-of-128) divisor of T that covers `halo`."""
    d = 128
    while d < T:
        if T % d == 0 and d >= halo:
            return d
        d += 128
    return T


def _pick_tile_rows(H, W, c_in, c_out, pad, out_bytes, max_tile_rows,
                    vmem_budget=20 * 1024 * 1024):
    """Largest row count Tr (dividing H) whose per-step buffers fit the budget."""
    halo = pad * (W + 1)
    kk = (2 * pad + 1) ** 2
    best = None
    for tr in range(1, H + 1):
        if H % tr:
            continue
        T = tr * W
        if T < halo:
            continue
        if (T % 128 != 0) and (T != H * W):        # lane-dense stores / (8,128) rule
            continue
        if max_tile_rows is not None and tr > max_tile_rows:
            continue
        bh = _pick_halo_block(T, halo)
        est = (2 * c_in * (T + 2 * bh) * 4         # double-buffered f32 input blocks
               + 2 * c_out * T * out_bytes         # double-buffered output blocks
               + c_in * (T + 2 * halo) * 2         # xbuf scratch (bf16)
               + kk * c_in * T * 2                 # staging scratch (bf16)
               + 2 * c_out * T * 4)                # f32 matmul result / epilogue temps
        if est > vmem_budget:
            continue
        best = tr
    return best if best is not None else H         # whole image as a last resort


# ---------------------------------------------------------------------------
# Wrapper
# ---------------------------------------------------------------------------
@functools.partial(jax.jit, static_argnames=("stride", "pad", "compute_dtype",
                                             "out_dtype", "max_tile_rows"))
def basic_conv_forward(x, weight, gamma, beta, running_mean, running_var, *,
                       stride=1, pad=1, compute_dtype=jnp.bfloat16,
                       out_dtype=jnp.float32, max_tile_rows=None):
    """Fused Conv2d(bias=False) + BatchNorm2d(eval) + LeakyReLU(0.01).

    x:      (N, C_in, H, W)   f32, NCHW (PyTorch convention)
    weight: (C_out, C_in, KH, KW)
    returns (N, C_out, H, W)  out_dtype (f32 default; bf16 for chained layers)
    """
    n, c_in, h, w_dim = x.shape
    c_out, c_in_w, kh, kw = weight.shape
    assert c_in_w == c_in
    assert stride == 1, "only stride=1 BasicConv configs are implemented"
    assert kh == kw and pad == (kh - 1) // 2, "only 'same' padding implemented"

    hw = h * w_dim
    halo = pad * (w_dim + 1)                       # flat halo length per side

    out_bytes = jnp.dtype(out_dtype).itemsize
    tr = _pick_tile_rows(h, w_dim, c_in, c_out, pad, out_bytes, max_tile_rows)
    T = tr * w_dim
    n_tiles = h // tr
    bh = _pick_halo_block(T, halo)                 # lane-aligned halo block size
    hpb = T // bh                                  # halo blocks per tile
    n_halo_blocks = hw // bh
    assert n_tiles * T == hw and T % bh == 0 and bh >= halo

    # Fold eval-mode BN scale into the conv weight; only the bias enters the kernel.
    scale = gamma / jnp.sqrt(running_var + BN_EPS)                 # (C_out,)
    bias = (beta - running_mean * scale).reshape(c_out, 1).astype(jnp.float32)
    w_scaled = weight * scale[:, None, None, None]                 # (C_out,C_in,KH,KW)
    w_packed = jnp.transpose(w_scaled, (0, 2, 3, 1))               # (C_out,KH,KW,C_in)
    w_packed = w_packed.reshape(c_out, kh * kw * c_in).astype(compute_dtype)

    # Activation: free reshape only — no pad, no cast, no copy in the wrapper.
    x_flat = x.reshape(n, c_in, hw)

    kernel = functools.partial(_conv_bn_lrelu_kernel,
                               W=w_dim, KH=kh, KW=kw, PAD=pad,
                               T=T, A=halo, BH=bh, C_IN=c_in)

    out_flat = pl.pallas_call(
        kernel,
        out_shape=jax.ShapeDtypeStruct((n, c_out, hw), out_dtype),
        grid_spec=pltpu.PrefetchScalarGridSpec(
            num_scalar_prefetch=0,
            grid=(n, n_tiles),
            in_specs=[
                # halo block just before this tile (clamped at the top edge)
                pl.BlockSpec((1, c_in, bh),
                             lambda b, t: (b, 0, jnp.maximum(t * hpb - 1, 0))),
                # the tile itself
                pl.BlockSpec((1, c_in, T), lambda b, t: (b, 0, t)),
                # halo block just after this tile (clamped at the bottom edge)
                pl.BlockSpec((1, c_in, bh),
                             lambda b, t: (b, 0, jnp.minimum((t + 1) * hpb,
                                                             n_halo_blocks - 1))),
                pl.BlockSpec((c_out, kh * kw * c_in), lambda b, t: (0, 0)),
                pl.BlockSpec((c_out, 1), lambda b, t: (0, 0)),
            ],
            out_specs=pl.BlockSpec((1, c_out, T), lambda b, t: (b, 0, t)),
            scratch_shapes=[
                pltpu.VMEM((c_in, T + 2 * halo), compute_dtype),      # xbuf
                pltpu.VMEM((kh * kw * c_in, T), compute_dtype),       # staged taps
            ],
        ),
        compiler_params=pltpu.CompilerParams(
            dimension_semantics=("parallel", "parallel"),   # batch x spatial tiles
            vmem_limit_bytes=48 * 1024 * 1024,              # v7x-safe (64 MiB phys)
        ),
    )(x_flat, x_flat, x_flat, w_packed, bias)

    return out_flat.reshape(n, c_out, h, w_dim)             # already NCHW


# ---------------------------------------------------------------------------
# References
# ---------------------------------------------------------------------------
def _reference_module_f32(x, weight, gamma, beta, running_mean, running_var,
                          *, stride=1, pad=1):
    """Exact f32 semantics of the PyTorch module (eval-mode BN)."""
    y = lax.conv_general_dilated(
        x, weight, window_strides=(stride, stride),
        padding=((pad, pad), (pad, pad)),
        dimension_numbers=("NCHW", "OIHW", "NCHW"))
    scale = (gamma / jnp.sqrt(running_var + BN_EPS)).reshape(1, -1, 1, 1)
    bias = (beta - running_mean * gamma / jnp.sqrt(running_var + BN_EPS)
            ).reshape(1, -1, 1, 1)
    y = y * scale + bias
    return jnp.where(y > 0, y, LEAKY_SLOPE * y)


def _reference_matched_precision(x, weight, gamma, beta, running_mean,
                                 running_var, *, stride=1, pad=1,
                                 compute_dtype=jnp.bfloat16):
    """Same math as the kernel (bf16 MXU operands, f32 accumulation)."""
    scale = gamma / jnp.sqrt(running_var + BN_EPS)
    bias = (beta - running_mean * scale).reshape(1, -1, 1, 1)
    w_s = (weight * scale[:, None, None, None]).astype(compute_dtype)
    y = lax.conv_general_dilated(
        x.astype(compute_dtype), w_s, window_strides=(stride, stride),
        padding=((pad, pad), (pad, pad)),
        dimension_numbers=("NCHW", "OIHW", "NCHW"),
        preferred_element_type=jnp.float32)
    y = y + bias
    return jnp.where(y > 0, y, LEAKY_SLOPE * y)


# ---------------------------------------------------------------------------
# Self-test
# ---------------------------------------------------------------------------
if __name__ == "__main__":
    def _run_case(key, N, C_IN, C_OUT, H, W, max_tile_rows):
        k = jax.random.split(key, 6)
        x = jax.random.normal(k[0], (N, C_IN, H, W), dtype=jnp.float32)
        weight = 0.1 * jax.random.normal(k[1], (C_OUT, C_IN, 3, 3), jnp.float32)
        gamma = 1.0 + 0.1 * jax.random.normal(k[2], (C_OUT,), jnp.float32)
        beta = 0.1 * jax.random.normal(k[3], (C_OUT,), jnp.float32)
        rmean = 0.1 * jax.random.normal(k[4], (C_OUT,), jnp.float32)
        rvar = jnp.abs(1.0 + 0.1 * jax.random.normal(k[5], (C_OUT,), jnp.float32))

        out = basic_conv_forward(x, weight, gamma, beta, rmean, rvar,
                                 stride=1, pad=1, max_tile_rows=max_tile_rows)
        out = jax.block_until_ready(out)
        assert out.shape == (N, C_OUT, H, W), out.shape

        # Strict check: same precision recipe (bf16 operands, f32 accumulation).
        ref_m = _reference_matched_precision(x, weight, gamma, beta, rmean, rvar)
        err_m = float(jnp.max(jnp.abs(out - ref_m)))
        assert jnp.allclose(out, ref_m, atol=2e-3, rtol=2e-3), (
            f"mismatch vs matched-precision reference (max abs err {err_m})")

        # Loose check: true f32 module semantics (bf16 rounding only difference).
        ref_f = _reference_module_f32(x, weight, gamma, beta, rmean, rvar)
        err_f = float(jnp.max(jnp.abs(out - ref_f)))
        assert jnp.allclose(out, ref_f, atol=5e-2, rtol=5e-2), (
            f"mismatch vs f32 module reference (max abs err {err_f})")

    key = jax.random.PRNGKey(0)
    k1, k2 = jax.random.split(key)
    # 4 spatial tiles: exercises top edge, interior halo exchange, bottom edge.
    _run_case(k1, N=2, C_IN=4, C_OUT=8, H=32, W=16, max_tile_rows=8)
    # Single-tile path (both zero-apron branches active in the same step).
    _run_case(k2, N=1, C_IN=8, C_OUT=16, H=16, W=16, max_tile_rows=None)

    print("KERNEL_OK")
</pallas_src>

<mosaic_0001>
module attributes {stable_mosaic.version = 11 : i64} {
  func.func @_conv_bn_lrelu_kernel(%arg0: i32, %arg1: i32, %arg2: memref<1x4x128xf32, #tpu.memory_space<vmem>>, %arg3: memref<1x4x128xf32, #tpu.memory_space<vmem>>, %arg4: memref<1x4x128xf32, #tpu.memory_space<vmem>>, %arg5: memref<8x36xbf16, #tpu.memory_space<vmem>>, %arg6: memref<8x1xf32, #tpu.memory_space<vmem>>, %arg7: memref<1x8x128xf32, #tpu.memory_space<vmem>>, %arg8: memref<4x162xbf16, #tpu.memory_space<vmem>>, %arg9: memref<36x128xbf16, #tpu.memory_space<vmem>>) attributes {dimension_semantics = [#tpu.dimension_semantics<parallel>, #tpu.dimension_semantics<parallel>], iteration_bounds = array<i64: 2, 4>, scalar_prefetch = 0 : i64, scratch_operands = 2 : i64, tpu.core_type = #tpu.core_type<tc>, window_params = [{transform_indices = @transform_0, window_bounds = array<i64: 1, 4, 128>}, {transform_indices = @transform_1, window_bounds = array<i64: 1, 4, 128>}, {transform_indices = @transform_2, window_bounds = array<i64: 1, 4, 128>}, {pipeline_mode = #tpu.pipeline_mode<synchronous>, transform_indices = @transform_3, window_bounds = array<i64: 8, 36>}, {pipeline_mode = #tpu.pipeline_mode<synchronous>, transform_indices = @transform_4, window_bounds = array<i64: 8, 1>}, {transform_indices = @transform_5, window_bounds = array<i64: 1, 8, 128>}]} {
    %c0 = arith.constant 0 : index
    %c0_0 = arith.constant 0 : index
    %c0_1 = arith.constant 0 : index
    %0 = vector.load %arg3[%c0, %c0_0, %c0_1] : memref<1x4x128xf32, #tpu.memory_space<vmem>>, vector<1x4x128xf32>
    %1 = vector.shape_cast %0 : vector<1x4x128xf32> to vector<4x128xf32>
    %2 = arith.truncf %1 : vector<4x128xf32> to vector<4x128xbf16>
    %c0_2 = arith.constant 0 : index
    %c17 = arith.constant 17 : index
    %3 = vector.load %arg8[%c0_2, %c17] : memref<4x162xbf16, #tpu.memory_space<vmem>>, vector<4x128xbf16>
    tpu.vector_store %arg8[%c0_2, %c17], %2 {strides = array<i32>} : memref<4x162xbf16, #tpu.memory_space<vmem>>, vector<4x128xbf16>,
    %c0_i32 = arith.constant 0 : i32
    %4 = arith.cmpi sgt, %arg1, %c0_i32 : i32
    %5 = arith.extui %4 : i1 to i32
    %c0_i32_3 = arith.constant 0 : i32
    %6 = arith.cmpi ne, %5, %c0_i32_3 : i32
    scf.if %6 {
      %c0_59 = arith.constant 0 : index
      %c0_60 = arith.constant 0 : index
      %c111 = arith.constant 111 : index
      %105 = vector.load %arg2[%c0_59, %c0_60, %c111] : memref<1x4x128xf32, #tpu.memory_space<vmem>>, vector<1x4x17xf32>
      %106 = vector.shape_cast %105 : vector<1x4x17xf32> to vector<4x17xf32>
      %107 = arith.truncf %106 : vector<4x17xf32> to vector<4x17xbf16>
      %c0_61 = arith.constant 0 : index
      %c0_62 = arith.constant 0 : index
      %108 = vector.load %arg8[%c0_61, %c0_62] : memref<4x162xbf16, #tpu.memory_space<vmem>>, vector<4x17xbf16>
      tpu.vector_store %arg8[%c0_61, %c0_62], %107 {strides = array<i32>} : memref<4x162xbf16, #tpu.memory_space<vmem>>, vector<4x17xbf16>,
    } else {
    }
    %c0_i32_4 = arith.constant 0 : i32
    %7 = arith.cmpi eq, %arg1, %c0_i32_4 : i32
    %8 = arith.extui %7 : i1 to i32
    %c0_i32_5 = arith.constant 0 : i32
    %9 = arith.cmpi ne, %8, %c0_i32_5 : i32
    scf.if %9 {
      %cst_59 = arith.constant 0.000000e+00 : bf16
      %105 = vector.broadcast %cst_59 : bf16 to vector<4x17xbf16>
      %c0_60 = arith.constant 0 : index
      %c0_61 = arith.constant 0 : index
      %106 = vector.load %arg8[%c0_60, %c0_61] : memref<4x162xbf16, #tpu.memory_space<vmem>>, vector<4x17xbf16>
      tpu.vector_store %arg8[%c0_60, %c0_61], %105 {strides = array<i32>} : memref<4x162xbf16, #tpu.memory_space<vmem>>, vector<4x17xbf16>,
    } else {
    }
    %c3_i32 = arith.constant 3 : i32
    %10 = arith.cmpi slt, %arg1, %c3_i32 : i32
    %11 = arith.extui %10 : i1 to i32
    %c0_i32_6 = arith.constant 0 : i32
    %12 = arith.cmpi ne, %11, %c0_i32_6 : i32
    scf.if %12 {
      %c0_59 = arith.constant 0 : index
      %c0_60 = arith.constant 0 : index
      %c0_61 = arith.constant 0 : index
      %105 = vector.load %arg4[%c0_59, %c0_60, %c0_61] : memref<1x4x128xf32, #tpu.memory_space<vmem>>, vector<1x4x17xf32>
      %106 = vector.shape_cast %105 : vector<1x4x17xf32> to vector<4x17xf32>
      %107 = arith.truncf %106 : vector<4x17xf32> to vector<4x17xbf16>
      %c0_62 = arith.constant 0 : index
      %c145 = arith.constant 145 : index
      %108 = vector.load %arg8[%c0_62, %c145] : memref<4x162xbf16, #tpu.memory_space<vmem>>, vector<4x17xbf16>
      tpu.vector_store %arg8[%c0_62, %c145], %107 {strides = array<i32>} : memref<4x162xbf16, #tpu.memory_space<vmem>>, vector<4x17xbf16>,
    } else {
    }
    %c3_i32_7 = arith.constant 3 : i32
    %13 = arith.cmpi eq, %arg1, %c3_i32_7 : i32
    %14 = arith.extui %13 : i1 to i32
    %c0_i32_8 = arith.constant 0 : i32
    %15 = arith.cmpi ne, %14, %c0_i32_8 : i32
    scf.if %15 {
      %cst_59 = arith.constant 0.000000e+00 : bf16
      %105 = vector.broadcast %cst_59 : bf16 to vector<4x17xbf16>
      %c0_60 = arith.constant 0 : index
      %c145 = arith.constant 145 : index
      %106 = vector.load %arg8[%c0_60, %c145] : memref<4x162xbf16, #tpu.memory_space<vmem>>, vector<4x17xbf16>
      tpu.vector_store %arg8[%c0_60, %c145], %105 {strides = array<i32>} : memref<4x162xbf16, #tpu.memory_space<vmem>>, vector<4x17xbf16>,
    } else {
    }
    %16 = tpu.iota {dimensions = array<i32: 1>} : vector<1x128xi32>
    %c16_i32 = arith.constant 16 : i32
    %c0_i32_9 = arith.constant 0 : i32
    %17 = arith.cmpi eq, %c16_i32, %c0_i32_9 : i32
    %c1_i32 = arith.constant 1 : i32
    %18 = arith.select %17, %c1_i32, %c16_i32 : i32
    %19 = vector.broadcast %18 : i32 to vector<1x128xi32>
    %20 = arith.remsi %16, %19 : vector<1x128xi32>
    %c0_i32_10 = arith.constant 0 : i32
    %21 = vector.broadcast %c0_i32_10 : i32 to vector<1x128xi32>
    %22 = arith.cmpi ne, %20, %21 : vector<1x128xi32>
    %c0_i32_11 = arith.constant 0 : i32
    %23 = vector.broadcast %c0_i32_11 : i32 to vector<1x128xi32>
    %24 = arith.cmpi slt, %20, %23 : vector<1x128xi32>
    %c0_i32_12 = arith.constant 0 : i32
    %25 = arith.cmpi slt, %18, %c0_i32_12 : i32
    %26 = vector.broadcast %25 : i1 to vector<1x128xi1>
    %27 = vector.broadcast %26 : vector<1x128xi1> to vector<1x128xi1>
    %28 = arith.xori %24, %27 : vector<1x128xi1>
    %29 = arith.andi %28, %22 : vector<1x128xi1>
    %30 = vector.broadcast %18 : i32 to vector<1x128xi32>
    %31 = arith.addi %20, %30 : vector<1x128xi32>
    %32 = arith.select %29, %31, %20 : vector<1x128xi1>, vector<1x128xi32>
    %c-1_i32 = arith.constant -1 : i32
    %33 = vector.broadcast %c-1_i32 : i32 to vector<1x128xi32>
    %34 = arith.addi %32, %33 : vector<1x128xi32>
    %c0_i32_13 = arith.constant 0 : i32
    %35 = vector.broadcast %c0_i32_13 : i32 to vector<1x128xi32>
    %36 = arith.cmpi sge, %34, %35 : vector<1x128xi32>
    %c-1_i32_14 = arith.constant -1 : i32
    %37 = vector.broadcast %c-1_i32_14 : i32 to vector<1x128xi32>
    %38 = arith.addi %32, %37 : vector<1x128xi32>
    %c16_i32_15 = arith.constant 16 : i32
    %39 = vector.broadcast %c16_i32_15 : i32 to vector<1x128xi32>
    %40 = arith.cmpi slt, %38, %39 : vector<1x128xi32>
    %41 = arith.andi %36, %40 : vector<1x128xi1>
    %c1_i32_16 = arith.constant 1 : i32
    %42 = vector.broadcast %c1_i32_16 : i32 to vector<1x128xi32>
    %43 = arith.addi %32, %42 : vector<1x128xi32>
    %c0_i32_17 = arith.constant 0 : i32
    %44 = vector.broadcast %c0_i32_17 : i32 to vector<1x128xi32>
    %45 = arith.cmpi sge, %43, %44 : vector<1x128xi32>
    %c1_i32_18 = arith.constant 1 : i32
    %46 = vector.broadcast %c1_i32_18 : i32 to vector<1x128xi32>
    %47 = arith.addi %32, %46 : vector<1x128xi32>
    %c16_i32_19 = arith.constant 16 : i32
    %48 = vector.broadcast %c16_i32_19 : i32 to vector<1x128xi32>
    %49 = arith.cmpi slt, %47, %48 : vector<1x128xi32>
    %50 = arith.andi %45, %49 : vector<1x128xi1>
    %c0_20 = arith.constant 0 : index
    %c0_21 = arith.constant 0 : index
    %51 = vector.load %arg8[%c0_20, %c0_21] : memref<4x162xbf16, #tpu.memory_space<vmem>>, vector<4x128xbf16>
    %cst = arith.constant 0.000000e+00 : bf16
    %52 = vector.shape_cast %41 : vector<1x128xi1> to vector<1x128xi1>
    %53 = vector.broadcast %52 : vector<1x128xi1> to vector<4x128xi1>
    %54 = vector.broadcast %cst : bf16 to vector<4x128xbf16>
    %55 = arith.select %53, %51, %54 : vector<4x128xi1>, vector<4x128xbf16>
    %c0_22 = arith.constant 0 : index
    %c0_23 = arith.constant 0 : index
    %56 = vector.load %arg9[%c0_22, %c0_23] : memref<36x128xbf16, #tpu.memory_space<vmem>>, vector<4x128xbf16>
    tpu.vector_store %arg9[%c0_22, %c0_23], %55 {strides = array<i32>} : memref<36x128xbf16, #tpu.memory_space<vmem>>, vector<4x128xbf16>,
    %c0_24 = arith.constant 0 : index
    %c1 = arith.constant 1 : index
    %57 = vector.load %arg8[%c0_24, %c1] : memref<4x162xbf16, #tpu.memory_space<vmem>>, vector<4x128xbf16>
    %c4 = arith.constant 4 : index
    %c0_25 = arith.constant 0 : index
    %58 = vector.load %arg9[%c4, %c0_25] : memref<36x128xbf16, #tpu.memory_space<vmem>>, vector<4x128xbf16>
    tpu.vector_store %arg9[%c4, %c0_25], %57 {strides = array<i32>} : memref<36x128xbf16, #tpu.memory_space<vmem>>, vector<4x128xbf16>,
    %c0_26 = arith.constant 0 : index
    %c2 = arith.constant 2 : index
    %59 = vector.load %arg8[%c0_26, %c2] : memref<4x162xbf16, #tpu.memory_space<vmem>>, vector<4x128xbf16>
    %cst_27 = arith.constant 0.000000e+00 : bf16
    %60 = vector.shape_cast %50 : vector<1x128xi1> to vector<1x128xi1>
    %61 = vector.broadcast %60 : vector<1x128xi1> to vector<4x128xi1>
    %62 = vector.broadcast %cst_27 : bf16 to vector<4x128xbf16>
    %63 = arith.select %61, %59, %62 : vector<4x128xi1>, vector<4x128xbf16>
    %c8 = arith.constant 8 : index
    %c0_28 = arith.constant 0 : index
    %64 = vector.load %arg9[%c8, %c0_28] : memref<36x128xbf16, #tpu.memory_space<vmem>>, vector<4x128xbf16>
    tpu.vector_store %arg9[%c8, %c0_28], %63 {strides = array<i32>} : memref<36x128xbf16, #tpu.memory_space<vmem>>, vector<4x128xbf16>,
    %c0_29 = arith.constant 0 : index
    %c16 = arith.constant 16 : index
    %65 = vector.load %arg8[%c0_29, %c16] : memref<4x162xbf16, #tpu.memory_space<vmem>>, vector<4x128xbf16>
    %cst_30 = arith.constant 0.000000e+00 : bf16
    %66 = vector.shape_cast %41 : vector<1x128xi1> to vector<1x128xi1>
    %67 = vector.broadcast %66 : vector<1x128xi1> to vector<4x128xi1>
    %68 = vector.broadcast %cst_30 : bf16 to vector<4x128xbf16>
    %69 = arith.select %67, %65, %68 : vector<4x128xi1>, vector<4x128xbf16>
    %c12 = arith.constant 12 : index
    %c0_31 = arith.constant 0 : index
    %70 = vector.load %arg9[%c12, %c0_31] : memref<36x128xbf16, #tpu.memory_space<vmem>>, vector<4x128xbf16>
    tpu.vector_store %arg9[%c12, %c0_31], %69 {strides = array<i32>} : memref<36x128xbf16, #tpu.memory_space<vmem>>, vector<4x128xbf16>,
    %c0_32 = arith.constant 0 : index
    %c17_33 = arith.constant 17 : index
    %71 = vector.load %arg8[%c0_32, %c17_33] : memref<4x162xbf16, #tpu.memory_space<vmem>>, vector<4x128xbf16>
    %c16_34 = arith.constant 16 : index
    %c0_35 = arith.constant 0 : index
    %72 = vector.load %arg9[%c16_34, %c0_35] : memref<36x128xbf16, #tpu.memory_space<vmem>>, vector<4x128xbf16>
    tpu.vector_store %arg9[%c16_34, %c0_35], %71 {strides = array<i32>} : memref<36x128xbf16, #tpu.memory_space<vmem>>, vector<4x128xbf16>,
    %c0_36 = arith.constant 0 : index
    %c18 = arith.constant 18 : index
    %73 = vector.load %arg8[%c0_36, %c18] : memref<4x162xbf16, #tpu.memory_space<vmem>>, vector<4x128xbf16>
    %cst_37 = arith.constant 0.000000e+00 : bf16
    %74 = vector.shape_cast %50 : vector<1x128xi1> to vector<1x128xi1>
    %75 = vector.broadcast %74 : vector<1x128xi1> to vector<4x128xi1>
    %76 = vector.broadcast %cst_37 : bf16 to vector<4x128xbf16>
    %77 = arith.select %75, %73, %76 : vector<4x128xi1>, vector<4x128xbf16>
    %c20 = arith.constant 20 : index
    %c0_38 = arith.constant 0 : index
    %78 = vector.load %arg9[%c20, %c0_38] : memref<36x128xbf16, #tpu.memory_space<vmem>>, vector<4x128xbf16>
    tpu.vector_store %arg9[%c20, %c0_38], %77 {strides = array<i32>} : memref<36x128xbf16, #tpu.memory_space<vmem>>, vector<4x128xbf16>,
    %c0_39 = arith.constant 0 : index
    %c32 = arith.constant 32 : index
    %79 = vector.load %arg8[%c0_39, %c32] : memref<4x162xbf16, #tpu.memory_space<vmem>>, vector<4x128xbf16>
    %cst_40 = arith.constant 0.000000e+00 : bf16
    %80 = vector.shape_cast %41 : vector<1x128xi1> to vector<1x128xi1>
    %81 = vector.broadcast %80 : vector<1x128xi1> to vector<4x128xi1>
    %82 = vector.broadcast %cst_40 : bf16 to vector<4x128xbf16>
    %83 = arith.select %81, %79, %82 : vector<4x128xi1>, vector<4x128xbf16>
    %c24 = arith.constant 24 : index
    %c0_41 = arith.constant 0 : index
    %84 = vector.load %arg9[%c24, %c0_41] : memref<36x128xbf16, #tpu.memory_space<vmem>>, vector<4x128xbf16>
    tpu.vector_store %arg9[%c24, %c0_41], %83 {strides = array<i32>} : memref<36x128xbf16, #tpu.memory_space<vmem>>, vector<4x128xbf16>,
    %c0_42 = arith.constant 0 : index
    %c33 = arith.constant 33 : index
    %85 = vector.load %arg8[%c0_42, %c33] : memref<4x162xbf16, #tpu.memory_space<vmem>>, vector<4x128xbf16>
    %c28 = arith.constant 28 : index
    %c0_43 = arith.constant 0 : index
    %86 = vector.load %arg9[%c28, %c0_43] : memref<36x128xbf16, #tpu.memory_space<vmem>>, vector<4x128xbf16>
    tpu.vector_store %arg9[%c28, %c0_43], %85 {strides = array<i32>} : memref<36x128xbf16, #tpu.memory_space<vmem>>, vector<4x128xbf16>,
    %c0_44 = arith.constant 0 : index
    %c34 = arith.constant 34 : index
    %87 = vector.load %arg8[%c0_44, %c34] : memref<4x162xbf16, #tpu.memory_space<vmem>>, vector<4x128xbf16>
    %cst_45 = arith.constant 0.000000e+00 : bf16
    %88 = vector.shape_cast %50 : vector<1x128xi1> to vector<1x128xi1>
    %89 = vector.broadcast %88 : vector<1x128xi1> to vector<4x128xi1>
    %90 = vector.broadcast %cst_45 : bf16 to vector<4x128xbf16>
    %91 = arith.select %89, %87, %90 : vector<4x128xi1>, vector<4x128xbf16>
    %c32_46 = arith.constant 32 : index
    %c0_47 = arith.constant 0 : index
    %92 = vector.load %arg9[%c32_46, %c0_47] : memref<36x128xbf16, #tpu.memory_space<vmem>>, vector<4x128xbf16>
    tpu.vector_store %arg9[%c32_46, %c0_47], %91 {strides = array<i32>} : memref<36x128xbf16, #tpu.memory_space<vmem>>, vector<4x128xbf16>,
    %c0_48 = arith.constant 0 : index
    %c0_49 = arith.constant 0 : index
    %93 = vector.load %arg5[%c0_48, %c0_49] : memref<8x36xbf16, #tpu.memory_space<vmem>>, vector<8x36xbf16>
    %c0_50 = arith.constant 0 : index
    %c0_51 = arith.constant 0 : index
    %94 = vector.load %arg9[%c0_50, %c0_51] : memref<36x128xbf16, #tpu.memory_space<vmem>>, vector<36x128xbf16>
    %cst_52 = arith.constant dense<0.000000e+00> : vector<8x128xf32>
    %95 = tpu.matmul %93, %94, %cst_52 {dimension_numbers = #tpu.dot_dimension_numbers<[1], [0], [0], [1], [0, 0, 1, 1], [], []>} : vector<8x36xbf16>, vector<36x128xbf16>, vector<8x128xf32> -> vector<8x128xf32>
    %c0_53 = arith.constant 0 : index
    %c0_54 = arith.constant 0 : index
    %96 = vector.load %arg6[%c0_53, %c0_54] : memref<8x1xf32, #tpu.memory_space<vmem>>, vector<8x1xf32>
    %97 = vector.broadcast %96 : vector<8x1xf32> to vector<8x128xf32>
    %98 = arith.addf %95, %97 : vector<8x128xf32>
    %cst_55 = arith.constant 0.00999999977 : f32
    %99 = vector.broadcast %cst_55 : f32 to vector<8x128xf32>
    %100 = arith.mulf %99, %98 : vector<8x128xf32>
    %101 = arith.maximumf %98, %100 : vector<8x128xf32>
    %c0_56 = arith.constant 0 : index
    %c0_57 = arith.constant 0 : index
    %c0_58 = arith.constant 0 : index
    %102 = vector.load %arg7[%c0_56, %c0_57, %c0_58] : memref<1x8x128xf32, #tpu.memory_space<vmem>>, vector<1x8x128xf32>
    %103 = vector.shape_cast %102 : vector<1x8x128xf32> to vector<8x128xf32>
    %104 = vector.shape_cast %101 : vector<8x128xf32> to vector<1x8x128xf32>
    tpu.vector_store %arg7[%c0_56, %c0_57, %c0_58], %104 {strides = array<i32>} : memref<1x8x128xf32, #tpu.memory_space<vmem>>, vector<1x8x128xf32>,
    return
  }
  func.func @transform_0(%arg0: i32, %arg1: i32) -> (i32, i32, i32) {
    %c1_i32 = arith.constant 1 : i32
    %0 = arith.muli %arg1, %c1_i32 : i32
    %c1_i32_0 = arith.constant 1 : i32
    %1 = arith.subi %0, %c1_i32_0 : i32
    %c0_i32 = arith.constant 0 : i32
    %2 = arith.maxsi %1, %c0_i32 : i32
    %c0_i32_1 = arith.constant 0 : i32
    %c0_i32_2 = arith.constant 0 : i32
    return %arg0, %c0_i32_1, %2 : i32, i32, i32
  }
  func.func @transform_1(%arg0: i32, %arg1: i32) -> (i32, i32, i32) {
    %c0_i32 = arith.constant 0 : i32
    %c0_i32_0 = arith.constant 0 : i32
    return %arg0, %c0_i32, %arg1 : i32, i32, i32
  }
  func.func @transform_2(%arg0: i32, %arg1: i32) -> (i32, i32, i32) {
    %c1_i32 = arith.constant 1 : i32
    %0 = arith.addi %arg1, %c1_i32 : i32
    %c1_i32_0 = arith.constant 1 : i32
    %1 = arith.muli %0, %c1_i32_0 : i32
    %c3_i32 = arith.constant 3 : i32
    %2 = arith.minsi %1, %c3_i32 : i32
    %c0_i32 = arith.constant 0 : i32
    %c0_i32_1 = arith.constant 0 : i32
    return %arg0, %c0_i32, %2 : i32, i32, i32
  }
  func.func @transform_3(%arg0: i32, %arg1: i32) -> (i32, i32) {
    %c0_i32 = arith.constant 0 : i32
    %c0_i32_0 = arith.constant 0 : i32
    %c0_i32_1 = arith.constant 0 : i32
    return %c0_i32, %c0_i32_0 : i32, i32
  }
  func.func @transform_4(%arg0: i32, %arg1: i32) -> (i32, i32) {
    %c0_i32 = arith.constant 0 : i32
    %c0_i32_0 = arith.constant 0 : i32
    %c0_i32_1 = arith.constant 0 : i32
    return %c0_i32, %c0_i32_0 : i32, i32
  }
  func.func @transform_5(%arg0: i32, %arg1: i32) -> (i32, i32, i32) {
    %c0_i32 = arith.constant 0 : i32
    %c0_i32_0 = arith.constant 0 : i32
    return %arg0, %c0_i32, %arg1 : i32, i32, i32
  }
}

</mosaic_0001>

<bundles_post_ra>
// kernel: basic_conv_forward.1
= control target key start
LH: loop header
LB: loop body
LE: loop exit
PB: predicated region body
PF: predicated region fallthrough
CT: control target
= control target key end

     0   :  { %s1049_s18 = smov 0   ;;  %s1051_s19 = smov 0   ;;  %s1148_s0 = inlined_call_operand.vmem [shape: f32[2,4,512], index: 0, kind: input, shape index: {}, may-alias: {0,1,2}]   ;;  %s1149_s1 = inlined_call_operand.vmem [shape: f32[2,4,512], index: 1, kind: input, shape index: {}, may-alias: {0,1,2}]   ;;  %s1150_s2 = inlined_call_operand.vmem [shape: f32[2,4,512], index: 2, kind: input, shape index: {}, may-alias: {0,1,2}]   ;;  %s1151_s3 = inlined_call_operand.vmem [shape: bf16[8,36], index: 3, kind: input, shape index: {}]   ;;  %s1152_s4 = inlined_call_operand.vmem [shape: f32[8,1], index: 4, kind: input, shape index: {}]   ;;  %s1153_s5 = inlined_call_operand.vmem [shape: f32[2,8,512], index: 5, kind: output, shape index: {}]  }
   0x1   :  { %s1053_s20 = smov 0   ;;  %s1055_s21 = smov 0  }
   0x2   :  { %s1057_s22 = smov 0  }
   0x3 LB: > { %s24_s23 = sadd.s32 1, %s987_s20  ;;  %s27_s24 = sadd.s32 1, %s991_s21  ;;  %s995_s22 = sphi %s1057_s22, %s15_s22   ;;  %s991_s21 = sphi %s1055_s21, %s1157_s21   ;;  %s987_s20 = sphi %s1053_s20, %s1156_s20   ;;  %s983_s19 = sphi %s1051_s19, %s1155_s19   ;;  %s979_s18 = sphi %s1049_s18, %s1154_s18  }
   0x4   : > { %p25_p0 = scmp.ge.s32.totalorder %s24_s23, 4  ;;  %p843_p1 = scmp.ge.s32.totalorder %s995_s22, 1 }
   0x5   : > { %p260_p2 = scmp.lt.s32.totalorder %s995_s22, 9 }
   0x6   : > { %s1159_s23 = smov (%p25_p0, %s24_s23), 0  ;;  %s1161_s24 = smov (!%p25_p0, %s27_s24), %s991_s21 }
   0x7   : > { %p261_p3 = pnand %p843_p1, %p260_p2  ;;  %p29_p4 = scmp.ge.s32.totalorder %s1161_s24, 2 }
   0x8   : > { %s844_s25 = sadd.s32 (!%p261_p3), 4294967295, %s979_s18  ;;  %p319_p5 = scmp.lt.s32.totalorder (!%p261_p3), %s983_s19, 1  ;;  %v997_v0 = vmov (!%p261_p3), 1983009808   ;;  %v369_v2 = vlaneseq (!%p261_p3)  ;;  %vm379_vm0 = vcmask (!%p261_p3), 1041544   ;;  %vm380_vm1 = vcmask (!%p261_p3), 134146  }
   0x9   : > { %s1163_s24 = smov (%p29_p4, %s1161_s24), 0  ;;  %264 = sbr.rel (%p261_p3) target bundleno = 784 (0x310), region = 40 }
   0xa   : > { %p317_p6 = scmp.gt.s32.totalorder (!%p261_p3), %s844_s25, 0  ;;  %p845_p7 = scmp.lt.s32.totalorder (!%p261_p3), %s844_s25, 3  ;;  %v367_v1 = vunpack.c.l.s4 (!%p261_p3), %v997_v0  ;;  %v370_v4 = vshrl.u32 (!%p261_p3), %v369_v2, 7  ;;  %vm376_vm2 = vcmask (!%p261_p3), 138240   ;;  %vm381_vm3 = vmor (!%p261_p3), %vm380_vm1, %vm379_vm0 }
   0xb   : > { %p332_p8 = scmp.lt.s32.totalorder (!%p261_p3), %s979_s18, 3  ;;  %s338_s29 = sadd.s32 (!%p261_p3), 1, %s979_s18 }
   0xc   : > { %v368_v3 = vunpack.c.0.s8 (!%p261_p3), %v367_v1  ;;  %p339_p9 = scmp.lt.s32.totalorder (!%p261_p3), %s338_s29, 3  ;;  %p861_p10 = scmp.le.s32.totalorder (!%p261_p3), %s979_s18, 0 }
   0xe   : > { %v1095_v5 = vsub.s32 (!%p261_p3), %v368_v3, %v370_v4 }
  0x10   : > { %s1165_s19 = smov (!%p319_p5, %s983_s19), 1  ;;  %s1167_s25 = smov (!%p317_p6, %s844_s25), 0 }
  0x11   : > { %s850_s26 = sshll.u32 %s1165_s19, 2  ;;  %s1169_s25 = smov (!%p845_p7, %s1167_s25), 3  ;;  %vm400_vm4 = vcmask (!%p861_p10), 132096  }
  0x12   : > { %s333_s27 = scalar_select %p332_p8, %s979_s18, 3 }
  0x13   : > { %s324_s28 = sadd.s32 %s1169_s25, %s850_s26  ;;  %s1171_s29 = smov (!%p339_p9, %s338_s29), 3 }
  0x14   : > { %s1086_s30 = sshll.u32 %s324_s28, 2  ;;  %s335_s6 = sadd.s32 %s850_s26, %s333_s27 }
  0x15   : > { %s326_s9 = scalar_lea.vmem %s1148_s0, %s1086_s30  ;;  %s853_s10 = sshll.u32 %s335_s6, 2 }
  0x16   : > { %s337_s13 = scalar_lea.vmem %s1149_s1, %s853_s10  ;;  %s860_s14 = sshll.u32 %s335_s6, 3  ;;  %v387_v12 = vld [vmem:[%s326_s9] sm:$0xf] (!%p861_p10) }
  0x17   : > { %v363_v6 = vld [vmem:[%s337_s13] sm:$0xf]  ;;  %s1100_s17 = scalar_lea.vmem %s1153_s5, %s860_s14  ;;  %s1173_s29 = smov (!%p339_p9, %s1171_s29), 3  ;;  %v388_v13 = vpack.c.bf16 (!%p861_p10), %v387_v12, %v387_v12 }
  0x18   : > { %v364_v7 = vpack.c.bf16 %v363_v6, %v363_v6  ;;  %s346_s19 = sadd.s32 %s850_s26, %s1173_s29  ;;  %s998_s25 = smov 17  }
  0x19   : > { %s858_s27 = sshll.u32 %s346_s19, 2  ;;  %v396_v14 = vrot.slane (!%p861_p10), %v388_v13, %v1095_v5  ;;  %s999_s26 = smov (!%p861_p10), 17  }
  0x1a   : > { %v372_v8 = vrot.slane %v364_v7, %v1095_v5  ;;  %s348_s7 = scalar_lea.vmem %s1150_s2, %s858_s27 }
  0x1c   : > { %373 = vrot.lane.b32.xlu0 %v372_v8, %s998_s25 }
  0x20   : > { %397 = vrot.lane.b32.xlu0 (!%p861_p10), %v396_v14, %s999_s26 }
  0x8c   : > { %386 = sbr.rel (%p861_p10) target bundleno = 148 (0x94), region = 44 }
  0x8e   : > { %v374_v9 = vpop.permute.xlu0 %373 }
  0x8f   : > { %v375_v10 = vrot.slane %v374_v9, 6 }
  0x91   : > { %v377_v11 = vsel %vm376_vm2, %v375_v10, %v374_v9 }
  0x92   : > { %382 = vst.msk [vmem:[#allocation2] sm:$0xf] %vm381_vm3, %v377_v11  ;;  %v398_v15 = vpop.permute.xlu0 (!%p861_p10), %397 }
  0x93   : > { %401 = vst.msk [vmem:[#allocation2] sm:$0x3] %vm400_vm4, %v398_v15 }
  0x94 PF: > { %p862_p11 = scmp.ne.s32.totalorder %s979_s18, 0 }
  0x95   : > { %vm406_vm5 = vcmask (!%p862_p11), 132096   ;;  %v1000_v16 = vmov (!%p862_p11), 0  }
  0x96   : > { %405 = sbr.rel (%p862_p11) target bundleno = 157 (0x9d), region = 48  ;;  %407 = vst.msk [vmem:[#allocation2] sm:$0x3] (!%p862_p11), %vm406_vm5, %v1000_v16 }
  0x9d PF: > { %p863_p12 = scmp.ge.s32.totalorder %s979_s18, 3 }
  0x9e   : > { %v412_v17 = vld [vmem:[%s348_s7] sm:$0xf] (!%p863_p12)  ;;  %s1001_s29 = smov (!%p863_p12), 17   ;;  %vm425_vm6 = vcmask (!%p863_p12), 271496  }
  0x9f   : > { %411 = sbr.rel (%p863_p12) target bundleno = 279 (0x117), region = 52  ;;  %v413_v18 = vpack.c.bf16 (!%p863_p12), %v412_v17, %v412_v17 }
  0xa1   : > { %v421_v19 = vrot.slane (!%p863_p12), %v413_v18, %v1095_v5 }
  0xa3   : > { %422 = vrot.lane.b32.xlu0 (!%p863_p12), %v421_v19, %s1001_s29 }
 0x115   : > { %v423_v20 = vpop.permute.xlu0 %422 }
 0x116   : > { %426 = vst.msk [vmem:[#allocation2 + $0x2] sm:$0x3] %vm425_vm6, %v423_v20 }
 0x117 PF: > { %p864_p13 = scmp.ne.s32.totalorder %s979_s18, 3 }
 0x118   : > { %vm431_vm7 = vcmask (!%p864_p13), 271496   ;;  %v1002_v21 = vmov (!%p864_p13), 0  }
 0x119   : > { %430 = sbr.rel (%p864_p13) target bundleno = 288 (0x120), region = 56  ;;  %432 = vst.msk [vmem:[#allocation2 + $0x2] sm:$0x3] (!%p864_p13), %vm431_vm7, %v1002_v21 }
 0x120 PF: > { %v434_v22 = vand.u32 127, %v369_v2  ;;  %v1003_v23 = vmov 0   ;;  %v455_v29 = vld [vmem:[#allocation2] sm:$0x3]  ;;  %s1004_s18 = smov 16   ;;  %s1005_s6 = smov 18  }
 0x121   : > { %950 = vset.pattern.permute.xlu1 %v1003_v23  ;;  %951 = vset.pattern.permute.xlu0 %v1003_v23  ;;  %v952_v35 = vld [vmem:[#allocation2] ss:$0 sps:$4 sm:$0xff]   ;;  %s1006_s8 = smov 2   ;;  %s1007_s9 = smov 32   ;;  %vm514_vm12 = vcmask 130048   ;;  %vm554_vm13 = vcmask 146432  }
 0x122   : > { %v439_v24 = vand.u32 15, %v434_v22  ;;  %v472_v36 = vrot.slane %v952_v35, %v1095_v5  ;;  %s1008_s10 = smov 34   ;;  %s1009_s11 = smov 127   ;;  %v509_v42 = vld [vmem:[#allocation2] sm:$0xf]  ;;  %vm490_vm0 = vcmask 15360  }
 0x123   : > { %v865_v37 = vld.sshfl [vmem:[#allocation2] sm:$0x33 pattern:$0x76325410]  ;;  %s1010_s12 = smov 111   ;;  %vm578_vm1 = vcmask 261120  }
 0x124   : > { %v447_v25 = vadd.s32 4294967295, %v439_v24  ;;  %v451_v26 = vadd.s32 1, %v439_v24  ;;  %v550_v43 = vld [vmem:[#allocation2] sm:$0xf]  ;;  %vm618_vm2 = vcmask 277504   ;;  %vm476_vm3 = vcmask 1039360  }
 0x125   : > { %v480_v53 = vld [vmem:[#allocation2] sm:$0xf]  ;;  %s1011_s13 = smov 112   ;;  %v1012_v7 = vmov 0.0   ;;  %s1013_s14 = smov 126   ;;  %vm546_vm7 = vcmask 908288  }
 0x126   : > { %vm448_vm8 = vcmp.ge.s32.totalorder %v447_v25, 0  ;;  %vm453_vm9 = vcmp.lt.s32.totalorder %v451_v26, 16  ;;  %v574_v54 = vld [vmem:[#allocation2] sm:$0xf]  ;;  %878 = vmatprep.subr.bf16.mxu0 %v1012_v7  ;;  %s1014_s15 = smov 110   ;;  %s1015_s16 = smov 96  }
 0x127   : > { %v458_v27 = vsel %vm448_vm8, 1, %v1003_v23  ;;  %v483_v28 = vsel %vm453_vm9, 1, %v1003_v23  ;;  %v614_v2 = vld [vmem:[#allocation2] sm:$0xf]  ;;  %s1016_s19 = smov 95   ;;  %s1017_s25 = smov 94  }
 0x128   : > { %v459_v30 = vpack.c.b16 %v458_v27, %v458_v27  ;;  %v484_v31 = vpack.c.b16 %v483_v28, %v483_v28  ;;  %v953_v3 = vld [vmem:[#allocation2] ss:$0 sps:$4 sm:$0xff]   ;;  %vm1018_vm8 = vmmov 0   ;;  %vm530_vm9 = vcmask 916480  }
 0x129   : > { %v606_v13 = vrot.slane %v953_v3, %v1095_v5  ;;  %884 = vmatprep.mubr.msk.bf16.mxu0 %vm1018_vm8, %v1012_v7  ;;  %v643_v16 = vld [vmem:[%s1152_s4] sm:$0xff] }
 0x12a   : > { %vm460_vm10 = vcmp.ne.s16.totalorder %v459_v30, 0  ;;  %vm485_vm11 = vcmp.ne.s16.totalorder %v484_v31, 0 }
 0x12b   : > { %v510_v32 = vsel %vm460_vm10, 65537, %v1003_v23  ;;  %v461_v33 = vsel %vm460_vm10, %v455_v29, 0  ;;  %v486_v34 = vsel %vm485_vm11, 65537, %v1003_v23  ;;  %vm505_vm10 = vcmask 1031168  }
 0x12c   : > { %511 = vrot.lane.b32.xlu0 %v510_v32, %s1004_s18  ;;  %462 = vst [vmem:[#allocation3] sm:$0x3] %v461_v33  ;;  %551 = vrot.lane.b32.xlu1 %v486_v34, %s1005_s6  ;;  %vm570_vm11 = vcmask 900096  }
 0x130   : > { %487 = vrot.lane.b32.xlu0 %v486_v34, %s1006_s8  ;;  %575 = vrot.lane.b32.xlu1 %v510_v32, %s1007_s9 }
 0x134   : > { %615 = vrot.lane.b32.xlu0 %v486_v34, %s1008_s10  ;;  %473 = vrot.lane.b32.xlu1 %v472_v36, %s1009_s11 }
 0x138   : > { %543 = vrot.lane.b32.xlu0 %v865_v37, %s1010_s12 }
 0x19e   : > { %v512_v38 = vpop.permute.xlu0 %511  ;;  %v552_v39 = vpop.permute.xlu1 %551 }
 0x19f   : > { %v513_v40 = vrot.slane %v512_v38, 6  ;;  %v553_v41 = vrot.slane %v552_v39, 6 }
 0x1a1   : > { %v515_v44 = vsel %vm514_vm12, %v513_v40, %v512_v38  ;;  %v555_v45 = vsel %vm554_vm13, %v553_v41, %v552_v39  ;;  %vm593_vm12 = vcmask 785408   ;;  %vm610_vm13 = vcmask 777216   ;;  %v637_v38 = vld [vmem:[%s1151_s3] sm:$0xf] }
 0x1a2   : > { %vm516_vm14 = vcmp.ne.s16.totalorder %v515_v44, 0  ;;  %vm556_vm15 = vcmp.ne.s16.totalorder %v555_v45, 0  ;;  %v488_v46 = vpop.permute.xlu0 %487  ;;  %v576_v47 = vpop.permute.xlu1 %575 }
 0x1a3   : > { %v517_v48 = vsel %vm516_vm14, %v509_v42, 0  ;;  %v557_v49 = vsel %vm556_vm15, %v550_v43, 0  ;;  %v489_v50 = vrot.slane %v488_v46, 6  ;;  %v577_v51 = vrot.slane %v576_v47, 6 }
 0x1a4   : > { %v519_v52 = vcombine.low %v517_v48, %v517_v48  ;;  %v559_v58 = vcombine.low %v557_v49, %v557_v49  ;;  %vm633_vm14 = vcmask 769024   ;;  %vm668_vm15 = vcmask 1041408  }
 0x1a5   : > { %v491_v55 = vsel %vm490_vm0, %v489_v50, %v488_v46  ;;  %v579_v56 = vsel %vm578_vm1, %v577_v51, %v576_v47  ;;  %vm664_vm0 = vcmask 293888  }
 0x1a6   : > { %v526_v57 = vrot.slane %v519_v52, %v1095_v5  ;;  %vm492_vm4 = vcmp.ne.s16.totalorder %v491_v55, 0  ;;  %vm580_vm5 = vcmp.ne.s16.totalorder %v579_v56, 0  ;;  %v616_v59 = vpop.permute.xlu0 %615  ;;  %v474_v60 = vpop.permute.xlu1 %473  ;;  %v566_v8 = vrot.slane %v559_v58, %v1095_v5 }
 0x1a7   : > { %v493_v61 = vsel %vm492_vm4, %v480_v53, 0  ;;  %v581_v62 = vsel %vm580_vm5, %v574_v54, 0  ;;  %v617_v63 = vrot.slane %v616_v59, 6  ;;  %v475_v0 = vrot.slane %v474_v60, 4 }
 0x1a8   : > { %v501_v1 = vrot.slane %v493_v61, %v1095_v5  ;;  %527 = vrot.lane.b32.xlu1 %v526_v57, %s1011_s13  ;;  %v589_v9 = vrot.slane %v581_v62, %v1095_v5 }
 0x1a9   : > { %v619_v4 = vsel %vm618_vm2, %v617_v63, %v616_v59  ;;  %v477_v6 = vsel %vm476_vm3, %v474_v60, %v475_v0 }
 0x1aa   : > { %vm620_vm6 = vcmp.ne.s16.totalorder %v619_v4, 0  ;;  %502 = vrot.lane.b32.xlu0 %v501_v1, %s1013_s14  ;;  %479 = vst [vmem:[#allocation3] sm:$0xc] %v477_v6  ;;  %v544_v10 = vpop.permute.xlu0 %543 }
 0x1ab   : > { %v621_v11 = vsel %vm620_vm6, %v614_v2, 0  ;;  %v545_v12 = vrot.slane %v544_v10, 4 }
 0x1ac   : > { %567 = vrot.lane.b32.xlu1 %v566_v8, %s1014_s15  ;;  %v629_v15 = vrot.slane %v621_v11, %v1095_v5 }
 0x1ad   : > { %v547_v14 = vsel %vm546_vm7, %v544_v10, %v545_v12 }
 0x1ae   : > { %590 = vrot.lane.b32.xlu0 %v589_v9, %s1015_s16  ;;  %549 = vst [vmem:[#allocation3 + $0x8] sm:$0x3] %v547_v14 }
 0x1b0   : > { %607 = vrot.lane.b32.xlu1 %v606_v13, %s1016_s19 }
 0x1b2   : > { %630 = vrot.lane.b32.xlu0 %v629_v15, %s1017_s25 }
 0x1b4   : > { %646 = vperm.xlu1 %950, %v643_v16  }
 0x21a   : > { %v528_v17 = vpop.permute.xlu1 %527 }
 0x21b   : > { %v529_v18 = vrot.slane %v528_v17, 4 }
 0x21c   : > { %v503_v5 = vpop.permute.xlu0 %502 }
 0x21d   : > { %v531_v19 = vsel %vm530_vm9, %v528_v17, %v529_v18  ;;  %v504_v20 = vrot.slane %v503_v5, 4 }
 0x21e   : > { %533 = vst [vmem:[#allocation3 + $0x4] sm:$0xc] %v531_v19  ;;  %v568_v21 = vpop.permute.xlu1 %567 }
 0x21f   : > { %v506_v22 = vsel %vm505_vm10, %v503_v5, %v504_v20  ;;  %v569_v23 = vrot.slane %v568_v21, 4 }
 0x220   : > { %508 = vst [vmem:[#allocation3 + $0x4] sm:$0x3] %v506_v22  ;;  %v591_v24 = vpop.permute.xlu0 %590 }
 0x221   : > { %v571_v25 = vsel %vm570_vm11, %v568_v21, %v569_v23  ;;  %v592_v26 = vrot.slane %v591_v24, 4 }
 0x222   : > { %573 = vst [vmem:[#allocation3 + $0x8] sm:$0xc] %v571_v25  ;;  %v608_v27 = vpop.permute.xlu1 %607 }
 0x223   : > { %v594_v28 = vsel %vm593_vm12, %v591_v24, %v592_v26  ;;  %v609_v29 = vrot.slane %v608_v27, 4 }
 0x224   : > { %596 = vst [vmem:[#allocation3 + $0xc] sm:$0x3] %v594_v28  ;;  %v631_v30 = vpop.permute.xlu0 %630 }
 0x225   : > { %v611_v31 = vsel %vm610_vm13, %v608_v27, %v609_v29  ;;  %v632_v32 = vrot.slane %v631_v30, 4 }
 0x226   : > { %613 = vst [vmem:[#allocation3 + $0xc] sm:$0xc] %v611_v31 }
 0x227   : > { %v634_v33 = vsel %vm633_vm14, %v631_v30, %v632_v32  ;;  %v954_v34 = vld [vmem:[#allocation3] sm:$0xff]  }
 0x228   : > { %636 = vst [vmem:[#allocation3 + $0x10] sm:$0x3] %v634_v33  ;;  %879 = vmatpush3.bf16.msra.mxu0 %v954_v34 }
 0x229   : > { %880 = vmatprep.subr.bf16.mxu0 %v1012_v7 }
 0x22d   : > { %v955_v35 = vld [vmem:[#allocation3 + $0x8] sm:$0xff]  }
 0x22e   : > { %881 = vmatpush3.bf16.msra.mxu0 %v955_v35 }
 0x22f   : > { %v956_v36 = vld [vmem:[#allocation3 + $0x10] ss:$0 sps:$4 sm:$0x33]   ;;  %882 = vmatprep.subr.bf16.mxu0 %v1012_v7 }
 0x230   : > { %v670_v37 = vsel %vm668_vm15, %v956_v36, 0 }
 0x232   : > { %883 = vmatpush3.bf16.msra.mxu0 %v670_v37 }
 0x233   : > { %v647_v39 = vpop.permute.xlu1 %646 }
 0x235   : > { %885 = vmatmul.mubr.msk.bf16.vlgmr.msra.gmra.mrb[0].mxu0 %vm664_vm0, %v637_v38 }
 0x308   : > { %v706_v40 = vpop.f32.mrb[0].mxu0 }
 0x309   : > { %v707_v41 = vadd.f32 %v706_v40, %v647_v39  ;;  %v886_v42 = vpop.f32.mrb[1].mxu0 }
 0x30a   : > { %v709_v43 = vpop.f32.mrb[2].mxu0 }
 0x30b   : > { %v712_v44 = vmul.f32 0.01, %v707_v41  ;;  %v887_v45 = vpop.f32.mrb[3].mxu0 }
 0x30d   : > { %v713_v46 = vmax.f32 %v707_v41, %v712_v44 }
 0x30f   : > { %714 = vst [vmem:[%s1100_s17] sm:$0xff] %v713_v46 }
 0x310 PF: > { %s15_s22 = sadd.s32 1, %s995_s22   ;;  %s1154_s18 = smov %s987_s20 }
 0x311   : > { %p12_p0 = scmp.ge.s32.totalorder %s15_s22, 10   ;;  %s1155_s19 = smov %s991_s21 }
 0x312   : > { %s1156_s20 = smov %s1159_s23  ;;  %s1157_s21 = smov %s1163_s24 }
 0x313   :  { %14 = sbr.rel (!%p12_p0) target bundleno = 3 (0x3), region = 92 }

</bundles_post_ra>
